<compile_context>
chip_gen: v6e
topology: v6e:2x2x1
jax: 0.10.0
libtpu: 0.0.40
codegen_flags: <defaults>
</compile_context>

<pallas_src>
from functools import partial

import jax
import jax.numpy as jnp
from jax.experimental import pallas as pl
from jax.experimental.pallas import tpu as pltpu


# ----------------------------- helpers --------------------------------------


def _round_up(x, m):
    return ((x + m - 1) // m) * m


def _cdiv(a, b):
    return -(-a // b)


def _pad_dims(in_dim, out_dim):
    """Static (per-model) padded feature dims and N tile size."""
    # K padded to 256: full systolic passes on the 2x256x256 MXUs (v6e/v7x);
    # zero padding keeps the dot exact.  N is 128-aligned for lane-dense vst.
    in_p = _round_up(in_dim, 256)
    out_p = _round_up(out_dim, 128)
    w_bytes = in_p * out_p * 2  # resident bf16 weight
    if w_bytes > (8 << 20) and out_p >= 1024:
        tn = 512                         # multiple of 256 (v6e/v7x MXU geometry)
        out_p = _round_up(out_dim, tn)   # bounds the per-tile W VMEM cost
    else:
        tn = out_p                       # weight small enough to stay whole
    return in_p, out_p, tn


def _row_tiling(m):
    """Row tile size / padded rows / number of row tiles for batch M."""
    m16 = _round_up(m, 16)               # bf16 packs 16 rows per vreg
    nt = _cdiv(m16, 512)                 # ~512-row tiles near the HBM roofline
    if m16 >= 256:
        nt = max(nt, 2)                  # v7x: give the parallel axis >=2 points
    tm = _round_up(_cdiv(m16, nt), 16)
    m_p = nt * tm
    return tm, m_p, nt


# ----------------------------- Pallas kernel --------------------------------


def linear_kernel(x_ref, w_ref, b_ref, o_ref):
    """One output tile: o = x @ W + b (W stored (in, out); bf16 in, f32 acc)."""
    o_ref[...] = (
        jnp.dot(x_ref[...], w_ref[...], preferred_element_type=jnp.float32)
        + b_ref[...]
    )


# ------------------------------ forward -------------------------------------


@partial(jax.jit, static_argnums=(3, 4, 5, 6, 7))
def _linear_forward(x, w_p, b_p, in_dim, out_dim, in_p, out_p, tn):
    lead = x.shape[:-1]
    x2 = x.reshape(-1, in_dim)
    m = x2.shape[0]
    tm, m_p, n_row = _row_tiling(m)
    n_col = out_p // tn

    # Cast to bf16 for the MXU; pad only when actually needed.  Explicit zero
    # padding of the K dim is required for exactness (Pallas edge-block padding
    # is not guaranteed to be zero).
    xb = x2.astype(jnp.bfloat16)
    if (m_p, in_p) != (m, in_dim):
        xb = jnp.pad(xb, ((0, m_p - m), (0, in_p - in_dim)))

    # Scoped-VMEM budget from the actual tile buffers (double-buffered inputs
    # and outputs); raised above v5e's 16 MiB default, capped at v7x physical.
    vmem_bytes = (
        2 * tm * in_p * 2        # x tiles, bf16
        + 2 * tm * tn * 4        # out tiles, f32
        + 2 * in_p * tn * 2      # weight tile, bf16
        + 2 * 8 * tn * 4         # bias tile, f32 (sublane-padded)
    )
    vmem_limit = int(min(max(vmem_bytes + (2 << 20), 32 << 20), 64 << 20))

    out_pad = pl.pallas_call(
        linear_kernel,
        out_shape=jax.ShapeDtypeStruct((m_p, out_p), jnp.float32),
        grid_spec=pltpu.PrefetchScalarGridSpec(
            num_scalar_prefetch=0,
            # N axis outermost: each weight tile is fetched once and stays
            # resident in VMEM across all row tiles (weights are the dominant
            # HBM stream for small/medium M).
            grid=(n_col, n_row),
            in_specs=[
                pl.BlockSpec((tm, in_p), lambda j, i: (i, 0)),   # x row tile
                pl.BlockSpec((in_p, tn), lambda j, i: (0, j)),   # W column tile
                pl.BlockSpec((1, tn), lambda j, i: (0, j)),      # bias tile
            ],
            out_specs=pl.BlockSpec((tm, tn), lambda j, i: (i, j)),
        ),
        compiler_params=pltpu.CompilerParams(
            dimension_semantics=("parallel", "parallel"),
            vmem_limit_bytes=vmem_limit,
        ),
    )(xb, w_p, b_p)

    out = out_pad
    if (m_p, out_p) != (m, out_dim):
        out = out[:m, :out_dim]
    return out.reshape(*lead, out_dim)


class MLPPredictor:
    """JAX/Pallas port of PyTorch MLP_Predictor (forward = one Linear layer).

    The weight is transposed to (in, out), zero-padded and cast to bf16 ONCE
    here, so the per-call wrapper does no weight-side work.
    """

    # TODO(synk): hidden_size=512 exists in MLP_Predictor.__init__ but is unused
    # by forward() (the net is a single Linear), so it is intentionally not modeled.

    def __init__(self, w, b):
        out_dim, in_dim = w.shape
        self.in_dim, self.out_dim = in_dim, out_dim
        self.in_p, self.out_p, self.tn = _pad_dims(in_dim, out_dim)
        self.w_p = jnp.pad(
            w.T.astype(jnp.bfloat16),
            ((0, self.in_p - in_dim), (0, self.out_p - out_dim)),
        )
        self.b_p = jnp.pad(
            b.astype(jnp.float32), (0, self.out_p - out_dim)
        ).reshape(1, self.out_p)

    def __call__(self, x):
        return _linear_forward(
            x, self.w_p, self.b_p,
            self.in_dim, self.out_dim, self.in_p, self.out_p, self.tn,
        )


# ------------------------------ setup ----------------------------------------


def init_params(key, input_size, output_size):
    """Deterministic params mimicking nn.Linear's uniform init."""
    kw, kb = jax.random.split(key)
    bound = 1.0 / (float(input_size) ** 0.5)
    w = jax.random.uniform(kw, (output_size, input_size), jnp.float32,
                           minval=-bound, maxval=bound)
    b = jax.random.uniform(kb, (output_size,), jnp.float32,
                           minval=-bound, maxval=bound)
    return w, b


if __name__ == "__main__":
    BATCH = 16
    IN_DIM = 64
    OUT_DIM = 32

    key = jax.random.PRNGKey(0)
    k_x, k_p = jax.random.split(key)

    x = jax.random.normal(k_x, (BATCH, IN_DIM), jnp.float32)
    w, b = init_params(k_p, IN_DIM, OUT_DIM)

    model = MLPPredictor(w, b)
    out = jax.block_until_ready(model(x))
    assert out.shape == (BATCH, OUT_DIM)

    # Pure-JAX f32 reference (PyTorch Linear semantics).  bf16 matmul operands
    # with f32 accumulation -> loosen tolerance accordingly.
    ref = x @ w.T + b
    assert jnp.allclose(out, ref, atol=5e-2, rtol=5e-2), float(
        jnp.max(jnp.abs(out - ref)))

    print("KERNEL_OK")
</pallas_src>

<mosaic_0001>
module attributes {stable_mosaic.version = 11 : i64} {
  func.func @linear_kernel(%arg0: i32, %arg1: i32, %arg2: memref<16x256xbf16, #tpu.memory_space<vmem>>, %arg3: memref<256x128xbf16, #tpu.memory_space<vmem>>, %arg4: memref<1x128xf32, #tpu.memory_space<vmem>>, %arg5: memref<16x128xf32, #tpu.memory_space<vmem>>) attributes {dimension_semantics = [#tpu.dimension_semantics<parallel>, #tpu.dimension_semantics<parallel>], iteration_bounds = array<i64: 1, 1>, scalar_prefetch = 0 : i64, scratch_operands = 0 : i64, tpu.core_type = #tpu.core_type<tc>, window_params = [{transform_indices = @transform_0, window_bounds = array<i64: 16, 256>}, {transform_indices = @transform_1, window_bounds = array<i64: 256, 128>}, {transform_indices = @transform_2, window_bounds = array<i64: 1, 128>}, {transform_indices = @transform_3, window_bounds = array<i64: 16, 128>}]} {
    %c0 = arith.constant 0 : index
    %c0_0 = arith.constant 0 : index
    %0 = vector.load %arg2[%c0, %c0_0] : memref<16x256xbf16, #tpu.memory_space<vmem>>, vector<16x256xbf16>
    %c0_1 = arith.constant 0 : index
    %c0_2 = arith.constant 0 : index
    %1 = vector.load %arg3[%c0_1, %c0_2] : memref<256x128xbf16, #tpu.memory_space<vmem>>, vector<256x128xbf16>
    %cst = arith.constant dense<0.000000e+00> : vector<16x128xf32>
    %2 = tpu.matmul %0, %1, %cst {dimension_numbers = #tpu.dot_dimension_numbers<[1], [0], [0], [1], [0, 0, 1, 1], [], []>} : vector<16x256xbf16>, vector<256x128xbf16>, vector<16x128xf32> -> vector<16x128xf32>
    %c0_3 = arith.constant 0 : index
    %c0_4 = arith.constant 0 : index
    %3 = vector.load %arg4[%c0_3, %c0_4] : memref<1x128xf32, #tpu.memory_space<vmem>>, vector<1x128xf32>
    %4 = vector.broadcast %3 : vector<1x128xf32> to vector<16x128xf32>
    %5 = arith.addf %2, %4 : vector<16x128xf32>
    %c0_5 = arith.constant 0 : index
    %c0_6 = arith.constant 0 : index
    %6 = vector.load %arg5[%c0_5, %c0_6] : memref<16x128xf32, #tpu.memory_space<vmem>>, vector<16x128xf32>
    tpu.vector_store %arg5[%c0_5, %c0_6], %5 {strides = array<i32>} : memref<16x128xf32, #tpu.memory_space<vmem>>, vector<16x128xf32>,
    return
  }
  func.func @transform_0(%arg0: i32, %arg1: i32) -> (i32, i32) {
    %c0_i32 = arith.constant 0 : i32
    %c0_i32_0 = arith.constant 0 : i32
    return %arg1, %c0_i32 : i32, i32
  }
  func.func @transform_1(%arg0: i32, %arg1: i32) -> (i32, i32) {
    %c0_i32 = arith.constant 0 : i32
    %c0_i32_0 = arith.constant 0 : i32
    return %c0_i32, %arg0 : i32, i32
  }
  func.func @transform_2(%arg0: i32, %arg1: i32) -> (i32, i32) {
    %c0_i32 = arith.constant 0 : i32
    %c0_i32_0 = arith.constant 0 : i32
    return %c0_i32, %arg0 : i32, i32
  }
  func.func @transform_3(%arg0: i32, %arg1: i32) -> (i32, i32) {
    %c0_i32 = arith.constant 0 : i32
    return %arg1, %arg0 : i32, i32
  }
}

</mosaic_0001>

<bundles_post_ra>
// kernel: _linear_forward.1
= control target key start
LH: loop header
LB: loop body
LE: loop exit
PB: predicated region body
PF: predicated region fallthrough
CT: control target
= control target key end

     0   :  { %8 = vsyncpa [#allocation3], 0  ;;  %s388_s0 = inlined_call_operand.vmem [shape: bf16[16,256], index: 0, kind: input, shape index: {}]   ;;  %s389_s1 = inlined_call_operand.hbm [shape: bf16[256,128], index: 1, kind: input, shape index: {}]   ;;  %s390_s2 = inlined_call_operand.vmem [shape: f32[1,128], index: 2, kind: input, shape index: {}]   ;;  %s391_s3 = inlined_call_operand.hbm [shape: f32[16,128], index: 3, kind: output, shape index: {}]  }
   0x1   :  { %9 = vsyncpa [#allocation4], 0  ;;  %s347_s12 = smov [#allocation2]  }
   0x2   :  { %s17_s13 = sshll.u32 %s347_s12, 4  ;;  %s18_s13 = int_to_ptr.vmem [resolvable:$true] %s17_s13 }
   0x3   :  { %s311_s14 = scalar_lea.vmem %s18_s13, 2048  ;;  %p316_p1 = scmp.lt.s32.totalorder %s18_s13, %s18_s13 }
   0x4   :  { %p312_p0 = scmp.ne.s32.totalorder %s18_s13, %s311_s14  ;;  %p317_p2 = scmp.lt.s32.totalorder %s311_s14, %s311_s14 }
   0x6   :  { %p318_p3 = por %p317_p2, %p316_p1 }
   0x8   :  { %p319_p4 = pnand %p318_p3, %p312_p0 }
   0xa   :  { %322 = shalt.err (!%p319_p4)
}
   0xb   :  { %s348_s15 = smov 64   ;;  %s349_s16 = smov 4  }
   0xc   :  { %23 = dma.hbm_to_vmem [thread:$0]  %s389_s1, 2048, %s18_s13, [#allocation3], %s348_s15, %s348_s15, %s349_s16  }
   0xd   :  { %343 = dma.done.wait [#allocation3], 2048  }
   0xe   :  { %344 = vsyncadd [#allocation3], 4294965248  ;;  %v284_v0 = vld [vmem:[#allocation2 + $0x78] sm:$0xff]   ;;  %v286_v2 = vld [vmem:[#allocation2 + $0x70] sm:$0xff]   ;;  %s350_s24 = smov [#allocation5]  }
   0xf   :  { %v285_v1 = vld [vmem:[#allocation2 + $0x38] sm:$0xff]   ;;  %256 = vmatprep.subr.bf16.mxu0 %v284_v0  ;;  %v287_v3 = vld [vmem:[#allocation2 + $0x30] sm:$0xff]   ;;  %v288_v4 = vld [vmem:[#allocation2 + $0x68] sm:$0xff]   ;;  %s225_s25 = sshll.u32 %s350_s24, 4  ;;  %s226_s25 = int_to_ptr.vmem [resolvable:$true] %s225_s25 }
  0x10   :  { %257 = vmatpush3.bf16.msra.mxu0 %v285_v1  ;;  %v289_v5 = vld [vmem:[#allocation2 + $0x28] sm:$0xff]   ;;  %v290_v6 = vld [vmem:[#allocation2 + $0x60] sm:$0xff]   ;;  %v292_v8 = vld [vmem:[#allocation2 + $0x58] sm:$0xff]   ;;  %p328_p6 = scmp.lt.s32.totalorder %s226_s25, %s226_s25 }
  0x11   :  { %258 = vmatprep.subr.bf16.mxu0 %v286_v2  ;;  %v291_v7 = vld [vmem:[#allocation2 + $0x20] sm:$0xff]   ;;  %v293_v9 = vld [vmem:[#allocation2 + $0x18] sm:$0xff]   ;;  %v294_v10 = vld [vmem:[#allocation2 + $0x50] sm:$0xff]  }
  0x12   :  { %v302_v11 = vld [vmem:[%s388_s0 + $0x4] ss:$8 sps:$4 sm:$0xff]   ;;  %v295_v12 = vld [vmem:[#allocation2 + $0x10] sm:$0xff]   ;;  %v300_v17 = vld [vmem:[%s388_s0] ss:$8 sps:$4 sm:$0xff]   ;;  %s323_s0 = scalar_lea.vmem %s226_s25, 256 }
  0x13   :  { %209 = vmatprep.mubr.bf16.mxu0 %v302_v11  ;;  %v296_v13 = vld [vmem:[#allocation2 + $0x48] sm:$0xff]   ;;  %v298_v15 = vld [vmem:[#allocation2 + $0x40] sm:$0xff]   ;;  %p324_p5 = scmp.ne.s32.totalorder %s226_s25, %s323_s0  ;;  %p329_p7 = scmp.lt.s32.totalorder %s323_s0, %s323_s0 }
  0x14   :  { %259 = vmatpush3.bf16.msra.mxu0 %v287_v3  ;;  %v297_v14 = vld [vmem:[#allocation2 + $0x8] sm:$0xff]   ;;  %v299_v16 = vld [vmem:[#allocation2] sm:$0xff]  }
  0x15   :  { %260 = vmatprep.subr.bf16.mxu0 %v288_v4  ;;  %v237_v19 = vld [vmem:[%s390_s2] ss:$0 sm:$0xff]  ;;  %p330_p8 = por %p329_p7, %p328_p6 }
  0x17   :  { %p331_p9 = pnand %p330_p8, %p324_p5 }
  0x18   :  { %261 = vmatpush3.bf16.msra.mxu0 %v289_v5 }
  0x19   :  { %262 = vmatprep.subr.bf16.mxu0 %v290_v6 }
  0x1c   :  { %263 = vmatpush3.bf16.msra.mxu0 %v291_v7 }
  0x1d   :  { %264 = vmatprep.subr.bf16.mxu0 %v292_v8 }
  0x20   :  { %265 = vmatpush3.bf16.msra.mxu0 %v293_v9 }
  0x21   :  { %266 = vmatprep.subr.bf16.mxu0 %v294_v10 }
  0x24   :  { %267 = vmatpush3.bf16.msra.mxu0 %v295_v12 }
  0x25   :  { %268 = vmatprep.subr.bf16.mxu0 %v296_v13 }
  0x28   :  { %269 = vmatpush3.bf16.msra.mxu0 %v297_v14 }
  0x29   :  { %270 = vmatprep.subr.bf16.mxu0 %v298_v15 }
  0x2c   :  { %271 = vmatpush3.bf16.msra.mxu0 %v299_v16 }
  0x2f   :  { %210 = vmatmul.mubr.bf16.vlgmr.msra.gmra.mxu0 %v300_v17 }
  0xef   :  { %v272_v18 = vpop.f32.mrf.mxu0 }
  0xf1   :  { %v273_v20 = vpop.f32.mrf.mxu0 }
  0xf2   :  { %v274_v21 = vadd.f32 %v273_v20, %v272_v18 }
  0xf3   :  { %v275_v22 = vpop.f32.mrf.mxu0 }
  0xf4   :  { %v212_v23 = vadd.f32 %v274_v21, %v237_v19 }
  0xf5   :  { %v276_v24 = vpop.f32.mrf.mxu0 }
  0xf6   :  { %218 = vst [vmem:[#allocation5] sm:$0xff] %v212_v23  ;;  %v277_v25 = vadd.f32 %v276_v24, %v275_v22 }
  0xf8   :  { %v215_v26 = vadd.f32 %v277_v25, %v237_v19 }
  0xfa   :  { %219 = vst [vmem:[#allocation5 + $0x8] sm:$0xff] %v215_v26 }
  0xfb   :  { %334 = shalt.err (!%p331_p9)
}
  0xfc   :  { %s351_s2 = smov 128   ;;  %s352_s26 = smov 8  }
  0xfd   :  { %231 = dma.vmem_to_hbm [thread:$0]  %s226_s25, 256, %s391_s3, [#allocation4], %s351_s2, %s351_s2, %s352_s26  }
  0xfe   :  { %345 = dma.done.wait [#allocation4], 256  }
  0xff   :  { %346 = vsyncadd [#allocation4], 4294967040 }
 0x100   :  { %235 = vsyncpa [#allocation3], 1 }
 0x101   :  { %236 = vsyncpa [#allocation4], 1 }

</bundles_post_ra>
